<compile_context>
chip_gen: v7x
topology: tpu7x:2x2x1
jax: 0.10.0
libtpu: 0.0.40
codegen_flags: <defaults>
</compile_context>

<pallas_src>
import functools

import jax
import jax.numpy as jnp
from jax.experimental import pallas as pl
from jax.experimental.pallas import tpu as pltpu

# ---- shrunk configuration (PyTorch module uses LATENT=100, NFM=64, n_layers=3) ----
LATENT_SHAPE = 16
NFM_GENERATOR = 16   # == image_dim passed to Generator(...)
N_CHANNELS = 3
N_LAYERS = 2
EPS = 1e-5
MAX_TILE_M = 512
LANE = 128


def _round_up(x, m):
    return ((x + m - 1) // m) * m


# --------------------------- Pallas kernel -----------------------------------
def _matmul_bias_act_kernel(x_ref, w_ref, b_ref, o_ref, *, act):
    """One (phase, M-tile): (TM, K)bf16 @ (K, Cp)bf16 -> f32 acc -> +bias -> act."""
    acc = jnp.dot(x_ref[...], w_ref[...], preferred_element_type=jnp.float32)
    y = acc + b_ref[...]                     # (TM, Cp) + (1, Cp) broadcast, f32
    if act == "relu":
        y = jnp.maximum(y, 0.0)
    elif act == "leaky_relu":
        y = jnp.where(y >= 0.0, y, 0.2 * y)
    elif act == "tanh":
        y = jnp.tanh(y)
    o_ref[...] = y.astype(o_ref.dtype)


def fused_matmul_bias_act(patches, w_mat, bias, act):
    """patches: (P, M, K) bf16; w_mat: (P, K, Cp) bf16; bias: (1, Cp) f32.

    Returns (P, M, Cp) f32 = act(patches @ w_mat + bias), batched over P.
    Cp must be a multiple of 128 (lane-dense output).
    """
    P, M, K = patches.shape
    coutp = w_mat.shape[-1]

    m8 = _round_up(M, 8)
    tile_m = min(m8, MAX_TILE_M)
    m_pad = _round_up(m8, tile_m)
    if m_pad != M:
        patches = jnp.pad(patches, ((0, 0), (0, m_pad - M), (0, 0)))

    out = pl.pallas_call(
        functools.partial(_matmul_bias_act_kernel, act=act),
        out_shape=jax.ShapeDtypeStruct((P, m_pad, coutp), jnp.float32),
        grid_spec=pltpu.PrefetchScalarGridSpec(
            num_scalar_prefetch=0,
            grid=(P, m_pad // tile_m),
            in_specs=[
                pl.BlockSpec((None, tile_m, K), lambda ph, i: (ph, i, 0)),
                pl.BlockSpec((None, K, coutp), lambda ph, i: (ph, 0, 0)),
                pl.BlockSpec((1, coutp), lambda ph, i: (0, 0)),
            ],
            out_specs=pl.BlockSpec((None, tile_m, coutp), lambda ph, i: (ph, i, 0)),
        ),
        compiler_params=pltpu.CompilerParams(
            dimension_semantics=("parallel", "parallel")),
    )(patches, w_mat, bias)
    return out[:, :M]


# ----------------- stride-2 ConvTranspose2d via sub-pixel phases --------------
def subpixel_convtranspose(x, w_mat, bias, cout, act):
    """x: (N, H, W, Cin) NHWC. Implements ConvTranspose2d(k=4, s=2, p=1) + bias
    + activation as 4 sub-pixel phases, each a 2x2 conv on the un-dilated input.
    Phase (rh, rw) produces output pixels (2q+rh, 2p+rw)."""
    N, H, W, cin = x.shape
    xb = x.astype(jnp.bfloat16)

    phase_patches = []
    for rh in (0, 1):
        for rw in (0, 1):
            pad_h = (1, 0) if rh == 0 else (0, 1)
            pad_w = (1, 0) if rw == 0 else (0, 1)
            xp = jnp.pad(xb, ((0, 0), pad_h, pad_w, (0, 0)))
            # 2x2 taps via slicing (no gather); K order = (th, tw, ci)
            taps = [xp[:, th:th + H, tw:tw + W, :]
                    for th in (0, 1) for tw in (0, 1)]
            phase_patches.append(
                jnp.concatenate(taps, axis=-1).reshape(N * H * W, 4 * cin))
    patches = jnp.stack(phase_patches, axis=0)              # (4, N*H*W, 4*cin)

    out = fused_matmul_bias_act(patches, w_mat, bias, act)  # (4, N*H*W, Cp) f32
    out = out[:, :, :cout].reshape(2, 2, N, H, W, cout)     # (rh, rw, N, H, W, C)
    out = jnp.transpose(out, (2, 3, 0, 4, 1, 5)).reshape(N, 2 * H, 2 * W, cout)
    return out


# ------------------------------ Generator -------------------------------------
def init_generator_params(key, n_layers=N_LAYERS, image_dim=NFM_GENERATOR,
                          latent=LATENT_SHAPE, n_channels=N_CHANNELS):
    # channel plan mirrors Generator.__init__ / build_gen_conv_cell
    plan = [(latent, image_dim * 8, 1, 0, "relu")]
    mult_prev = 8
    for layer in range(1, n_layers):
        mult = min(2 ** (n_layers - layer), 8)
        plan.append((image_dim * mult_prev, image_dim * mult, 2, 1, "leaky_relu"))
        mult_prev = mult
    mult = min(2 ** 0, 8)
    plan.append((image_dim * mult_prev, image_dim * mult, 2, 1, "leaky_relu"))
    mult_prev = mult
    plan.append((image_dim * mult_prev, n_channels, 2, 1, "tanh"))  # final, no BN

    params = []
    for cin, cout, stride, pad, act in plan:
        key, kw, kg, kb, km, kv = jax.random.split(key, 6)
        w = 0.02 * jax.random.normal(kw, (cin, cout, 4, 4), jnp.float32)
        if act != "tanh":
            # BatchNorm2d (eval mode) folded to per-channel scale/shift.
            gamma = 1.0 + 0.1 * jax.random.normal(kg, (cout,), jnp.float32)
            beta = 0.1 * jax.random.normal(kb, (cout,), jnp.float32)
            rmean = 0.1 * jax.random.normal(km, (cout,), jnp.float32)
            rvar = 1.0 + 0.1 * jax.random.uniform(kv, (cout,), jnp.float32)
            scale = gamma / jnp.sqrt(rvar + EPS)
            shift = beta - rmean * scale
        else:
            scale = jnp.ones((cout,), jnp.float32)
            shift = jnp.zeros((cout,), jnp.float32)

        # Fold BN scale into the conv weight, shift becomes a plain bias.
        w_folded = w * scale[None, :, None, None]

        if stride == 1:
            # layer 0: 1x1 input, k=4, p=0 -> dense projection latent -> 4*4*cout
            wm = jnp.transpose(w_folded, (0, 2, 3, 1)).reshape(cin, 16 * cout)
            cols = 16 * cout
            cols_pad = _round_up(cols, LANE)
            wm = jnp.pad(wm, ((0, 0), (0, cols_pad - cols)))
            b = jnp.pad(jnp.tile(shift, 16), (0, cols_pad - cols))
            layer = dict(kind="dense", act=act, cout=cout, cols=cols,
                         w_mat=wm.astype(jnp.bfloat16)[None],   # (1, cin, cols_pad)
                         bias=b.reshape(1, cols_pad))
        else:
            # stride-2 layer: precompute the 4 sub-pixel 2x2 weight matrices.
            coutp = _round_up(cout, LANE)
            mats = []
            for rh in (0, 1):
                kh_sel = [3, 1] if rh == 0 else [2, 0]
                for rw in (0, 1):
                    kw_sel = [3, 1] if rw == 0 else [2, 0]
                    wsel = w_folded[:, :, kh_sel, :][:, :, :, kw_sel]  # (ci,co,2,2)
                    wp = jnp.transpose(wsel, (2, 3, 0, 1)).reshape(4 * cin, cout)
                    mats.append(jnp.pad(wp, ((0, 0), (0, coutp - cout))))
            layer = dict(kind="subpixel", act=act, cout=cout,
                         w_mat=jnp.stack(mats, 0).astype(jnp.bfloat16),  # (4,4cin,Cp)
                         bias=jnp.pad(shift, (0, coutp - cout)).reshape(1, coutp))
        # keep raw tensors for the pure-JAX reference check
        layer.update(ref_w=w, ref_scale=scale, ref_shift=shift,
                     stride=stride, padding=pad)
        params.append(layer)
    return params


def generator_forward(params, z):
    N = z.shape[0]
    x = z.reshape(N, -1)                                   # (N, latent)
    for p in params:
        if p["kind"] == "dense":
            # tiny layer (M = batch); grid is (1,1) by design -- not worth splitting.
            patches = x.astype(jnp.bfloat16)[None]          # (1, N, latent)
            out = fused_matmul_bias_act(patches, p["w_mat"], p["bias"], p["act"])
            x = out[0, :, :p["cols"]].reshape(N, 4, 4, p["cout"])   # NHWC
        else:
            x = subpixel_convtranspose(x, p["w_mat"], p["bias"], p["cout"], p["act"])
    return jnp.transpose(x, (0, 3, 1, 2))                  # NCHW at module boundary


# --------------------------- pure-JAX reference --------------------------------
def _reference_forward(params, z):
    x = z                                                   # NCHW f32
    for p in params:
        w, stride, pad = p["ref_w"], p["stride"], p["padding"]
        k = 4
        rhs = jnp.transpose(w[:, :, ::-1, ::-1], (1, 0, 2, 3))   # (cout, cin, kh, kw)
        y = jax.lax.conv_general_dilated(
            x, rhs, window_strides=(1, 1),
            padding=[(k - 1 - pad, k - 1 - pad)] * 2,
            lhs_dilation=(stride, stride),
            dimension_numbers=("NCHW", "OIHW", "NCHW"),
            precision=jax.lax.Precision.HIGHEST)
        y = y * p["ref_scale"][None, :, None, None] + p["ref_shift"][None, :, None, None]
        if p["act"] == "relu":
            y = jnp.maximum(y, 0.0)
        elif p["act"] == "leaky_relu":
            y = jnp.where(y >= 0.0, y, 0.2 * y)
        else:
            y = jnp.tanh(y)
        x = y
    return x


if __name__ == "__main__":
    key = jax.random.PRNGKey(0)
    kp, kz = jax.random.split(key)
    params = init_generator_params(kp)
    z = jax.random.normal(kz, (2, LATENT_SHAPE, 1, 1), jnp.float32)

    out = generator_forward(params, z)
    out = jax.block_until_ready(out)

    expected_hw = 4 * (2 ** (N_LAYERS + 1))   # 4x4 seed, N_LAYERS+1 stride-2 upsamples
    assert out.shape == (2, N_CHANNELS, expected_hw, expected_hw), out.shape
    assert bool(jnp.all(jnp.isfinite(out)))
    assert bool(jnp.all(jnp.abs(out) <= 1.0 + 1e-6))   # tanh output range

    ref = _reference_forward(params, z)
    err = float(jnp.max(jnp.abs(out - ref)))
    assert err < 5e-2, f"max abs err vs reference: {err}"

    print("KERNEL_OK")
</pallas_src>

<mosaic_0001>
module attributes {stable_mosaic.version = 11 : i64} {
  func.func @_matmul_bias_act_kernel(%arg0: i32, %arg1: i32, %arg2: memref<1x8x16xbf16, #tpu.memory_space<vmem>>, %arg3: memref<1x16x2048xbf16, #tpu.memory_space<vmem>>, %arg4: memref<1x2048xf32, #tpu.memory_space<vmem>>, %arg5: memref<1x8x2048xf32, #tpu.memory_space<vmem>>) attributes {dimension_semantics = [#tpu.dimension_semantics<parallel>, #tpu.dimension_semantics<parallel>], iteration_bounds = array<i64: 1, 1>, scalar_prefetch = 0 : i64, scratch_operands = 0 : i64, tpu.core_type = #tpu.core_type<tc>, window_params = [{transform_indices = @transform_0, window_bounds = array<i64: 1, 8, 16>}, {transform_indices = @transform_1, window_bounds = array<i64: 1, 16, 2048>}, {pipeline_mode = #tpu.pipeline_mode<synchronous>, transform_indices = @transform_2, window_bounds = array<i64: 1, 2048>}, {transform_indices = @transform_3, window_bounds = array<i64: 1, 8, 2048>}]} {
    %c0 = arith.constant 0 : index
    %c0_0 = arith.constant 0 : index
    %c0_1 = arith.constant 0 : index
    %0 = vector.load %arg2[%c0, %c0_0, %c0_1] : memref<1x8x16xbf16, #tpu.memory_space<vmem>>, vector<1x8x16xbf16>
    %1 = vector.shape_cast %0 : vector<1x8x16xbf16> to vector<8x16xbf16>
    %c0_2 = arith.constant 0 : index
    %c0_3 = arith.constant 0 : index
    %c0_4 = arith.constant 0 : index
    %2 = vector.load %arg3[%c0_2, %c0_3, %c0_4] : memref<1x16x2048xbf16, #tpu.memory_space<vmem>>, vector<1x16x2048xbf16>
    %3 = vector.shape_cast %2 : vector<1x16x2048xbf16> to vector<16x2048xbf16>
    %cst = arith.constant dense<0.000000e+00> : vector<8x2048xf32>
    %4 = tpu.matmul %1, %3, %cst {dimension_numbers = #tpu.dot_dimension_numbers<[1], [0], [0], [1], [0, 0, 1, 1], [], []>} : vector<8x16xbf16>, vector<16x2048xbf16>, vector<8x2048xf32> -> vector<8x2048xf32>
    %c0_5 = arith.constant 0 : index
    %c0_6 = arith.constant 0 : index
    %5 = vector.load %arg4[%c0_5, %c0_6] : memref<1x2048xf32, #tpu.memory_space<vmem>>, vector<1x2048xf32>
    %6 = vector.broadcast %5 : vector<1x2048xf32> to vector<8x2048xf32>
    %7 = arith.addf %4, %6 : vector<8x2048xf32>
    %cst_7 = arith.constant 0.000000e+00 : f32
    %8 = vector.broadcast %cst_7 : f32 to vector<8x2048xf32>
    %9 = arith.maximumf %7, %8 : vector<8x2048xf32>
    %c0_8 = arith.constant 0 : index
    %c0_9 = arith.constant 0 : index
    %c0_10 = arith.constant 0 : index
    %10 = vector.load %arg5[%c0_8, %c0_9, %c0_10] : memref<1x8x2048xf32, #tpu.memory_space<vmem>>, vector<1x8x2048xf32>
    %11 = vector.shape_cast %10 : vector<1x8x2048xf32> to vector<8x2048xf32>
    %12 = vector.shape_cast %9 : vector<8x2048xf32> to vector<1x8x2048xf32>
    tpu.vector_store %arg5[%c0_8, %c0_9, %c0_10], %12 {strides = array<i32>} : memref<1x8x2048xf32, #tpu.memory_space<vmem>>, vector<1x8x2048xf32>,
    return
  }
  func.func @transform_0(%arg0: i32, %arg1: i32) -> (i32, i32, i32) {
    %c0_i32 = arith.constant 0 : i32
    %c0_i32_0 = arith.constant 0 : i32
    return %arg0, %arg1, %c0_i32 : i32, i32, i32
  }
  func.func @transform_1(%arg0: i32, %arg1: i32) -> (i32, i32, i32) {
    %c0_i32 = arith.constant 0 : i32
    %c0_i32_0 = arith.constant 0 : i32
    %c0_i32_1 = arith.constant 0 : i32
    return %arg0, %c0_i32, %c0_i32_0 : i32, i32, i32
  }
  func.func @transform_2(%arg0: i32, %arg1: i32) -> (i32, i32) {
    %c0_i32 = arith.constant 0 : i32
    %c0_i32_0 = arith.constant 0 : i32
    %c0_i32_1 = arith.constant 0 : i32
    return %c0_i32, %c0_i32_0 : i32, i32
  }
  func.func @transform_3(%arg0: i32, %arg1: i32) -> (i32, i32, i32) {
    %c0_i32 = arith.constant 0 : i32
    %c0_i32_0 = arith.constant 0 : i32
    return %arg0, %arg1, %c0_i32 : i32, i32, i32
  }
}

</mosaic_0001>

<bundles_post_ra>
// kernel: tpu_custom_call.1
= control target key start
LH: loop header
LB: loop body
LE: loop exit
PB: predicated region body
PF: predicated region fallthrough
CT: control target
= control target key end

     0   :  { %8 = vsyncpa [#allocation3], 0  ;;  %s852_s0 = inlined_call_operand.hbm [shape: bf16[1,8,16], index: 0, kind: input, shape index: {}]   ;;  %s853_s1 = inlined_call_operand.hbm [shape: bf16[1,16,2048], index: 1, kind: input, shape index: {}]   ;;  %s854_s2 = inlined_call_operand.hbm [shape: f32[1,2048], index: 2, kind: input, shape index: {}]   ;;  %s855_s3 = inlined_call_operand.hbm [shape: f32[1,8,2048], index: 3, kind: output, shape index: {}]  }
   0x1   :  { %9 = vsyncpa [#allocation6], 0 }
   0x2   :  { %10 = vsyncpa [#allocation4], 0  ;;  %s739_s12 = smov [#allocation5]   ;;  %s645_s16 = scalar_lea.hbm %s853_s1, 2048 }
   0x3   :  { %s26_s13 = sshll.u32 %s739_s12, 4  ;;  %p646_p0 = scmp.ne.s32.totalorder %s853_s1, %s645_s16  ;;  %s27_s13 = int_to_ptr.vmem [resolvable:$true] %s26_s13 }
   0x4   :  { %p649_p1 = scmp.lt.u32.totalorder %s645_s16, %s853_s1 }
   0x6   :  { %p651_p2 = pnand %p649_p1, %p646_p0 }
   0x8   :  { %654 = shalt.err (!%p651_p2)
}
   0x9   :  { %s655_s21 = scalar_lea.vmem %s27_s13, 2048  ;;  %p660_p4 = scmp.lt.s32.totalorder %s27_s13, %s27_s13 }
   0xa   :  { %p656_p3 = scmp.ne.s32.totalorder %s27_s13, %s655_s21  ;;  %p661_p5 = scmp.lt.s32.totalorder %s655_s21, %s655_s21 }
   0xc   :  { %p662_p6 = por %p661_p5, %p660_p4 }
   0xe   :  { %p663_p7 = pnand %p662_p6, %p656_p3 }
  0x10   :  { %666 = shalt.err (!%p663_p7)
}
  0x11   :  { %s740_s22 = smov 1024   ;;  %s741_s23 = smov 64  }
  0x12   :  { %32 = dma.hbm_to_vmem [thread:$0]  %s853_s1, 2048, %s27_s13, [#allocation6], %s740_s22, %s740_s22, %s741_s23  }
  0x13   :  { %s742_s26 = smov [#allocation2]   ;;  %s743_s28 = smov [#allocation7]  }
  0x14   :  { %s17_s27 = sshll.u32 %s742_s26, 4  ;;  %s39_s29 = sshll.u32 %s743_s28, 4  ;;  %s18_s27 = int_to_ptr.vmem [resolvable:$true] %s17_s27  ;;  %s40_s29 = int_to_ptr.vmem [resolvable:$true] %s39_s29 }
  0x15   :  { %s667_s5 = scalar_lea.hbm %s852_s0, 64 }
  0x16   :  { %p668_p8 = scmp.ne.s32.totalorder %s852_s0, %s667_s5  ;;  %p671_p9 = scmp.lt.u32.totalorder %s667_s5, %s852_s0 }
  0x18   :  { %p673_p10 = pnand %p671_p9, %p668_p8 }
  0x1a   :  { %676 = shalt.err (!%p673_p10)
}
  0x1b   :  { %s677_s1 = scalar_lea.vmem %s18_s27, 64  ;;  %p682_p12 = scmp.lt.s32.totalorder %s18_s27, %s18_s27 }
  0x1c   :  { %p678_p11 = scmp.ne.s32.totalorder %s18_s27, %s677_s1  ;;  %p683_p13 = scmp.lt.s32.totalorder %s677_s1, %s677_s1 }
  0x1e   :  { %p684_p0 = por %p683_p13, %p682_p12 }
  0x20   :  { %p685_p1 = pnand %p684_p0, %p678_p11 }
  0x22   :  { %688 = shalt.err (!%p685_p1)
}
  0x23   :  { %20 = dma.hbm_to_vmem [thread:$0]  %s852_s0, 64, %s18_s27, [#allocation3]  }
  0x24   :  { %s689_s14 = scalar_lea.hbm %s854_s2, 256 }
  0x25   :  { %p690_p2 = scmp.ne.s32.totalorder %s854_s2, %s689_s14  ;;  %p693_p3 = scmp.lt.u32.totalorder %s689_s14, %s854_s2 }
  0x27   :  { %p695_p4 = pnand %p693_p3, %p690_p2 }
  0x29   :  { %698 = shalt.err (!%p695_p4)
}
  0x2a   :  { %s699_s19 = scalar_lea.vmem %s40_s29, 256  ;;  %p704_p6 = scmp.lt.s32.totalorder %s40_s29, %s40_s29 }
  0x2b   :  { %p700_p5 = scmp.ne.s32.totalorder %s40_s29, %s699_s19  ;;  %p705_p7 = scmp.lt.s32.totalorder %s699_s19, %s699_s19 }
  0x2d   :  { %p706_p8 = por %p705_p7, %p704_p6 }
  0x2f   :  { %p707_p9 = pnand %p706_p8, %p700_p5 }
  0x31   :  { %710 = shalt.err (!%p707_p9)
}
  0x32   :  { %42 = dma.hbm_to_vmem [thread:$0]  %s854_s2, 256, %s40_s29, [#allocation6]  }
  0x33   :  { %733 = dma.done.wait [#allocation3], 64  }
  0x34   :  { %734 = vsyncadd [#allocation3], 4294967232 }
  0x35   :  { %735 = dma.done.wait [#allocation6], 2304  }
  0x36   :  { %736 = vsyncadd [#allocation6], 4294964992  ;;  %v744_v0 = vmov 0   ;;  %v54_v1 = vld [vmem:[#allocation5] sm:$0xff]  ;;  %v55_v3 = vld [vmem:[#allocation5 + $0x8] sm:$0xff]  ;;  %vm234_vm0 = vcmask 130048   ;;  %v74_v34 = vlaneseq }
  0x37   :  { %270 = vmatprep.mubr.bf16.mxu0 %v744_v0  ;;  %311 = vmatprep.mubr.bf16.mxu1 %v744_v0  ;;  %v62_v2 = vld [vmem:[#allocation5 + $0x40] sm:$0xff]  ;;  %v63_v5 = vld [vmem:[#allocation5 + $0x48] sm:$0xff]  ;;  %v56_v7 = vld [vmem:[#allocation5 + $0x10] sm:$0xff]  ;;  %s745_s2 = smov [#allocation8]  }
  0x38   :  { %v615_v4 = vcombine.high %v54_v1, %v62_v2  ;;  %v614_v6 = vcombine.low %v54_v1, %v62_v2  ;;  %v617_v8 = vcombine.high %v55_v3, %v63_v5  ;;  %v616_v9 = vcombine.low %v55_v3, %v63_v5  ;;  %v64_v10 = vld [vmem:[#allocation5 + $0x50] sm:$0xff]  ;;  %v57_v11 = vld [vmem:[#allocation5 + $0x18] sm:$0xff]  ;;  %v58_v15 = vld [vmem:[#allocation5 + $0x20] sm:$0xff]  ;;  %s604_s21 = sshll.u32 %s745_s2, 4  ;;  %s605_s21 = int_to_ptr.vmem [resolvable:$true] %s604_s21 }
  0x39   :  { %v65_v12 = vld [vmem:[#allocation5 + $0x58] sm:$0xff]  ;;  %v619_v13 = vcombine.high %v56_v7, %v64_v10  ;;  %v66_v16 = vld [vmem:[#allocation5 + $0x60] sm:$0xff]  ;;  %v618_v18 = vcombine.low %v56_v7, %v64_v10  ;;  %v59_v19 = vld [vmem:[#allocation5 + $0x28] sm:$0xff]  ;;  %v818_v35 = vshrl.u32 %v74_v34, 7  ;;  %s711_s22 = scalar_lea.vmem %s605_s21, 2048  ;;  %p716_p11 = scmp.lt.s32.totalorder %s605_s21, %s605_s21 }
  0x3a   :  { %238 = vmatprep.subr.bf16.mxu0 %v615_v4  ;;  %v621_v14 = vcombine.high %v57_v11, %v65_v12  ;;  %279 = vmatprep.subr.bf16.mxu1 %v617_v8  ;;  %v53_v17 = vld [vmem:[#allocation2] sm:$0xf]  ;;  %v67_v20 = vld [vmem:[#allocation5 + $0x68] sm:$0xff]  ;;  %v620_v21 = vcombine.low %v57_v11, %v65_v12  ;;  %v623_v22 = vcombine.high %v58_v15, %v66_v16  ;;  %v60_v24 = vld [vmem:[#allocation5 + $0x30] sm:$0xff]  ;;  %p712_p10 = scmp.ne.s32.totalorder %s605_s21, %s711_s22  ;;  %p717_p12 = scmp.lt.s32.totalorder %s711_s22, %s711_s22 }
  0x3b   :  { %239 = vmatpush1.bf16.msra.mxu0 %v614_v6  ;;  %280 = vmatpush1.bf16.msra.mxu1 %v616_v9  ;;  %v625_v23 = vcombine.high %v59_v19, %v67_v20  ;;  %v68_v25 = vld [vmem:[#allocation5 + $0x70] sm:$0xff]  ;;  %v622_v26 = vcombine.low %v58_v15, %v66_v16  ;;  %v61_v27 = vld [vmem:[#allocation5 + $0x38] sm:$0xff]  ;;  %v624_v29 = vcombine.low %v59_v19, %v67_v20  ;;  %v76_v36 = vsub.s32 0, %v818_v35  ;;  %v70_v37 = vld [vmem:[#allocation7] sm:$0xff] }
  0x3c   :  { %320 = vmatprep.subr.bf16.mxu0 %v619_v13  ;;  %361 = vmatprep.subr.bf16.mxu1 %v621_v14  ;;  %v69_v28 = vld [vmem:[#allocation5 + $0x78] sm:$0xff]  ;;  %v627_v30 = vcombine.high %v60_v24, %v68_v25  ;;  %v626_v32 = vcombine.low %v60_v24, %v68_v25  ;;  %v84_v38 = vsub.s32 2, %v818_v35  ;;  %v80_v39 = vsub.s32 1, %v818_v35  ;;  %v71_v13 = vld [vmem:[#allocation7 + $0x8] sm:$0xff]  ;;  %p718_p13 = por %p717_p12, %p716_p11 }
  0x3d   :  { %v629_v31 = vcombine.high %v61_v27, %v69_v28  ;;  %v628_v33 = vcombine.low %v61_v27, %v69_v28  ;;  %v88_v40 = vsub.s32 3, %v818_v35  ;;  %v77_v41 = vrot.slane %v70_v37, %v76_v36 }
  0x3e   :  { %630 = vmatmul.mubr.msk.bf16.vlgmr.msra.gmra.mrb[0].mxu0 %vm234_vm0, %v53_v17  ;;  %631 = vmatmul.mubr.msk.bf16.vlgmr.msra.gmra.mrb[0].mxu1 %vm234_vm0, %v53_v17  ;;  %v85_v42 = vrot.slane %v70_v37, %v84_v38  ;;  %v81_v43 = vrot.slane %v70_v37, %v80_v39  ;;  %v92_v49 = vsub.s32 4, %v818_v35  ;;  %v100_v54 = vsub.s32 6, %v818_v35  ;;  %p719_p0 = pnand %p718_p13, %p712_p10 }
  0x3f   :  { %321 = vmatpush1.bf16.msra.mxu0 %v618_v18  ;;  %362 = vmatpush1.bf16.msra.mxu1 %v620_v21  ;;  %v89_v44 = vrot.slane %v70_v37, %v88_v40  ;;  %v96_v55 = vsub.s32 5, %v818_v35  ;;  %v104_v60 = vsub.s32 7, %v818_v35  ;;  %v113_v24 = vrot.slane %v71_v13, %v80_v39 }
  0x40   :  { %352 = vmatprep.mubr.bf16.mxu0 %v744_v0  ;;  %393 = vmatprep.mubr.bf16.mxu1 %v744_v0  ;;  %v93_v1 = vrot.slane %v70_v37, %v92_v49  ;;  %v101_v2 = vrot.slane %v70_v37, %v100_v54  ;;  %v121_v25 = vrot.slane %v71_v13, %v88_v40 }
  0x41   :  { %402 = vmatprep.subr.bf16.mxu0 %v623_v22  ;;  %443 = vmatprep.subr.bf16.mxu1 %v625_v23  ;;  %v97_v3 = vrot.slane %v70_v37, %v96_v55  ;;  %v105_v4 = vrot.slane %v70_v37, %v104_v60  ;;  %v109_v22 = vrot.slane %v71_v13, %v76_v36 }
  0x42   :  { %v117_v23 = vrot.slane %v71_v13, %v84_v38  ;;  %v125_v39 = vrot.slane %v71_v13, %v92_v49  ;;  %v133_v40 = vrot.slane %v71_v13, %v100_v54 }
  0x46   :  { %632 = vmatmul.mubr.msk.bf16.vlgmr.msra.gmra.mrb[4].mxu0 %vm234_vm0, %v53_v17  ;;  %633 = vmatmul.mubr.msk.bf16.vlgmr.msra.gmra.mrb[4].mxu1 %vm234_vm0, %v53_v17 }
  0x47   :  { %403 = vmatpush1.bf16.msra.mxu0 %v622_v26  ;;  %444 = vmatpush1.bf16.msra.mxu1 %v624_v29 }
  0x48   :  { %434 = vmatprep.mubr.bf16.mxu0 %v744_v0  ;;  %475 = vmatprep.mubr.bf16.mxu1 %v744_v0 }
  0x49   :  { %484 = vmatprep.subr.bf16.mxu0 %v627_v30  ;;  %525 = vmatprep.subr.bf16.mxu1 %v629_v31 }
  0x4e   :  { %634 = vmatmul.mubr.msk.bf16.vlgmr.msra.gmra.mrb[8].mxu0 %vm234_vm0, %v53_v17  ;;  %635 = vmatmul.mubr.msk.bf16.vlgmr.msra.gmra.mrb[8].mxu1 %vm234_vm0, %v53_v17 }
  0x4f   :  { %485 = vmatpush1.bf16.msra.mxu0 %v626_v32  ;;  %526 = vmatpush1.bf16.msra.mxu1 %v628_v33 }
  0x50   :  { %516 = vmatprep.mubr.bf16.mxu0 %v744_v0  ;;  %557 = vmatprep.mubr.bf16.mxu1 %v744_v0 }
  0x56   :  { %636 = vmatmul.mubr.msk.bf16.vlgmr.msra.gmra.mrb[12].mxu0 %vm234_vm0, %v53_v17  ;;  %637 = vmatmul.mubr.msk.bf16.vlgmr.msra.gmra.mrb[12].mxu1 %vm234_vm0, %v53_v17 }
 0x111   :  { %v272_v45 = vpop.f32.mrb[0].mxu0  ;;  %v313_v47 = vpop.f32.mrb[0].mxu1 }
 0x112   :  { %v273_v46 = vadd.f32 %v272_v45, %v77_v41  ;;  %v274_v48 = vpop.f32.mrb[1].mxu0  ;;  %v314_v50 = vadd.f32 %v313_v47, %v85_v42  ;;  %v315_v52 = vpop.f32.mrb[1].mxu1  ;;  %v129_v45 = vrot.slane %v71_v13, %v96_v55 }
 0x113   :  { %v275_v51 = vadd.f32 %v274_v48, %v81_v43  ;;  %v276_v53 = vpop.f32.mrb[2].mxu0  ;;  %v316_v57 = vadd.f32 %v315_v52, %v89_v44  ;;  %v317_v58 = vpop.f32.mrb[2].mxu1 }
 0x114   :  { %v566_v56 = vmax.f32 %v273_v46, 0.0  ;;  %v277_v59 = vpop.f32.mrb[3].mxu0  ;;  %v568_v61 = vmax.f32 %v314_v50, 0.0  ;;  %v318_v63 = vpop.f32.mrb[3].mxu1  ;;  %v137_v46 = vrot.slane %v71_v13, %v104_v60 }
 0x115   :  { %v567_v62 = vmax.f32 %v275_v51, 0.0  ;;  %v569_v0 = vmax.f32 %v316_v57, 0.0 }
 0x116   :  { %582 = vst [vmem:[#allocation8] sm:$0xff] %v566_v56  ;;  %584 = vst [vmem:[#allocation8 + $0x10] sm:$0xff] %v568_v61 }
 0x117   :  { %583 = vst [vmem:[#allocation8 + $0x8] sm:$0xff] %v567_v62  ;;  %585 = vst [vmem:[#allocation8 + $0x18] sm:$0xff] %v569_v0 }
 0x119   :  { %v354_v5 = vpop.f32.mrb[4].mxu0  ;;  %v395_v7 = vpop.f32.mrb[4].mxu1 }
 0x11a   :  { %v355_v6 = vadd.f32 %v354_v5, %v93_v1  ;;  %v356_v8 = vpop.f32.mrb[5].mxu0  ;;  %v396_v9 = vadd.f32 %v395_v7, %v101_v2  ;;  %v397_v11 = vpop.f32.mrb[5].mxu1 }
 0x11b   :  { %v357_v10 = vadd.f32 %v356_v8, %v97_v3  ;;  %v358_v12 = vpop.f32.mrb[6].mxu0  ;;  %v398_v15 = vadd.f32 %v397_v11, %v105_v4  ;;  %v399_v16 = vpop.f32.mrb[6].mxu1 }
 0x11c   :  { %v570_v14 = vmax.f32 %v355_v6, 0.0  ;;  %v359_v17 = vpop.f32.mrb[7].mxu0  ;;  %v572_v18 = vmax.f32 %v396_v9, 0.0  ;;  %v400_v20 = vpop.f32.mrb[7].mxu1 }
 0x11d   :  { %v571_v19 = vmax.f32 %v357_v10, 0.0  ;;  %v573_v21 = vmax.f32 %v398_v15, 0.0 }
 0x11e   :  { %586 = vst [vmem:[#allocation8 + $0x20] sm:$0xff] %v570_v14  ;;  %588 = vst [vmem:[#allocation8 + $0x30] sm:$0xff] %v572_v18 }
 0x11f   :  { %587 = vst [vmem:[#allocation8 + $0x28] sm:$0xff] %v571_v19  ;;  %589 = vst [vmem:[#allocation8 + $0x38] sm:$0xff] %v573_v21 }
 0x121   :  { %v436_v26 = vpop.f32.mrb[8].mxu0  ;;  %v477_v28 = vpop.f32.mrb[8].mxu1 }
 0x122   :  { %v437_v27 = vadd.f32 %v436_v26, %v109_v22  ;;  %v438_v29 = vpop.f32.mrb[9].mxu0  ;;  %v478_v30 = vadd.f32 %v477_v28, %v117_v23  ;;  %v479_v32 = vpop.f32.mrb[9].mxu1 }
 0x123   :  { %v439_v31 = vadd.f32 %v438_v29, %v113_v24  ;;  %v440_v33 = vpop.f32.mrb[10].mxu0  ;;  %v480_v37 = vadd.f32 %v479_v32, %v121_v25  ;;  %v481_v41 = vpop.f32.mrb[10].mxu1 }
 0x124   :  { %v574_v34 = vmax.f32 %v437_v27, 0.0  ;;  %v441_v42 = vpop.f32.mrb[11].mxu0  ;;  %v576_v43 = vmax.f32 %v478_v30, 0.0  ;;  %v482_v44 = vpop.f32.mrb[11].mxu1 }
 0x125   :  { %v575_v36 = vmax.f32 %v439_v31, 0.0  ;;  %v577_v38 = vmax.f32 %v480_v37, 0.0 }
 0x126   :  { %590 = vst [vmem:[#allocation8 + $0x40] sm:$0xff] %v574_v34  ;;  %592 = vst [vmem:[#allocation8 + $0x50] sm:$0xff] %v576_v43 }
 0x127   :  { %591 = vst [vmem:[#allocation8 + $0x48] sm:$0xff] %v575_v36  ;;  %593 = vst [vmem:[#allocation8 + $0x58] sm:$0xff] %v577_v38 }
 0x129   :  { %v518_v47 = vpop.f32.mrb[12].mxu0  ;;  %v559_v50 = vpop.f32.mrb[12].mxu1 }
 0x12a   :  { %v519_v48 = vadd.f32 %v518_v47, %v125_v39  ;;  %v520_v51 = vpop.f32.mrb[13].mxu0  ;;  %v560_v52 = vadd.f32 %v559_v50, %v133_v40  ;;  %v561_v56 = vpop.f32.mrb[13].mxu1 }
 0x12b   :  { %v521_v53 = vadd.f32 %v520_v51, %v129_v45  ;;  %v522_v57 = vpop.f32.mrb[14].mxu0  ;;  %v562_v58 = vadd.f32 %v561_v56, %v137_v46  ;;  %v563_v59 = vpop.f32.mrb[14].mxu1 }
 0x12c   :  { %v578_v49 = vmax.f32 %v519_v48, 0.0  ;;  %v523_v61 = vpop.f32.mrb[15].mxu0  ;;  %v580_v54 = vmax.f32 %v560_v52, 0.0  ;;  %v564_v35 = vpop.f32.mrb[15].mxu1 }
 0x12d   :  { %v579_v62 = vmax.f32 %v521_v53, 0.0  ;;  %v581_v55 = vmax.f32 %v562_v58, 0.0 }
 0x12e   :  { %594 = vst [vmem:[#allocation8 + $0x60] sm:$0xff] %v578_v49  ;;  %596 = vst [vmem:[#allocation8 + $0x70] sm:$0xff] %v580_v54 }
 0x12f   :  { %595 = vst [vmem:[#allocation8 + $0x68] sm:$0xff] %v579_v62  ;;  %597 = vst [vmem:[#allocation8 + $0x78] sm:$0xff] %v581_v55 }
 0x130   :  { %722 = shalt.err (!%p719_p0)
}
 0x131   :  { %s723_s25 = scalar_lea.hbm %s855_s3, 2048 }
 0x132   :  { %p724_p1 = scmp.ne.s32.totalorder %s855_s3, %s723_s25  ;;  %p727_p2 = scmp.lt.u32.totalorder %s723_s25, %s855_s3 }
 0x134   :  { %p729_p3 = pnand %p727_p2, %p724_p1 }
 0x136   :  { %732 = shalt.err (!%p729_p3)
}
 0x137   :  { %607 = dma.vmem_to_hbm [thread:$0]  %s605_s21, 2048, %s855_s3, [#allocation4]  }
 0x138   :  { %737 = dma.done.wait [#allocation4], 2048  }
 0x139   :  { %738 = vsyncadd [#allocation4], 4294965248 }
 0x13a   :  { %611 = vsyncpa [#allocation3], 1 }
 0x13b   :  { %612 = vsyncpa [#allocation6], 1 }
 0x13c   :  { %613 = vsyncpa [#allocation4], 1 }

</bundles_post_ra>
